<compile_context>
chip_gen: v7x
topology: tpu7x:2x2x1
jax: 0.10.0
libtpu: 0.0.40
codegen_flags: <defaults>
</compile_context>

<pallas_src>
import functools

import jax
import jax.numpy as jnp
from jax import lax
from jax.experimental import pallas as pl
from jax.experimental.pallas import tpu as pltpu

EPS_ATTN = 1e-6
EPS_BN = 1e-5


def _fem_kernel(x_ref, mask_ref, wqkv_ref, bqkv_ref, w2_ref, b2_ref, gamma_ref,
                out_ref, *, C, Cq, Wp, S, n_valid, batch_tile):
    # Loaded once per grid step; reused across the batch tile.
    valid = mask_ref[...] > 0.5            # (1, S) bool: real vs pad lane columns
    wqkv = wqkv_ref[...]                   # (C+2Cq, C)   bf16  (conv1 folded in)
    bqkv = bqkv_ref[...]                   # (C+2Cq, 1)   f32   (conv1 folded in)
    b2 = b2_ref[...]                       # (C, 1)       f32
    gamma = gamma_ref[...]                 # (1, 1)       f32
    center = Wp + 1                        # lane offset of the (dy,dx)=(1,1) tap

    for bt in range(batch_tile):
        xb = x_ref[bt]                     # (C, Sin) bf16, zero-padded, rows in lanes

        # ---- conv2: 3x3 conv (+ folded eval-mode BN) as 9 lane-shifted matmuls
        acc = None
        for t in range(9):
            dy, dx = divmod(t, 3)
            t0 = dy * Wp + dx
            xs = xb[:, t0:t0 + S]                                  # (C, S) bf16
            part = jnp.dot(w2_ref[t], xs, preferred_element_type=jnp.float32)
            acc = part if acc is None else acc + part
        c2 = acc + b2                                              # (C, S) f32

        # ---- fused (conv1 ∘ Q/K/V) projections: one tall matmul on the centre tap
        xc = xb[:, center:center + S]                              # (C, S) bf16
        qkv = jnp.dot(wqkv, xc, preferred_element_type=jnp.float32) + bqkv
        v = qkv[0:C]                                               # (C,  S)
        q = qkv[C:C + Cq]                                          # (Cq, S)
        k = qkv[C + Cq:C + 2 * Cq]                                 # (Cq, S)

        # ---- linear attention; all reductions in f32, pad lanes masked out
        qn = q * lax.rsqrt(jnp.sum(q * q, axis=0, keepdims=True))  # (Cq, S)
        kn = k * lax.rsqrt(jnp.sum(k * k, axis=0, keepdims=True))  # (Cq, S)
        kn_m = jnp.where(valid, kn, 0.0)
        v_m = jnp.where(valid, v, 0.0)

        ksum = jnp.sum(kn_m, axis=1, keepdims=True) + EPS_ATTN     # (Cq, 1)
        denom = jnp.float32(n_valid) + jnp.sum(qn * ksum, axis=0, keepdims=True)
        tailor = pl.reciprocal(denom, approx=True)                 # (1, S)
        vsum = jnp.sum(v_m, axis=1, keepdims=True)                 # (C, 1)
        # matrix_t[c, m] = sum_n kn[m, n] * v[c, n]
        matrix_t = lax.dot_general(v_m, kn_m, (((1,), (1,)), ((), ())),
                                   preferred_element_type=jnp.float32)  # (C, Cq)
        msum = vsum + jnp.dot(matrix_t, qn, preferred_element_type=jnp.float32)
        attn = gamma * (msum * tailor)                             # (C, S)

        out_ref[bt] = (attn + c2).astype(out_ref.dtype)


def feature_extraction_forward(x, params, *, batch_tile=None):
    B, C, H, W = x.shape
    Cq = params['wq'].shape[0]
    Wp = W + 2
    S = H * Wp                       # output span: H real rows, each with 2 pad cols
    Sin = (H + 3) * Wp               # 1 top pad row, H rows, 2 bottom pad rows
    n_valid = H * W

    if batch_tile is None:           # keep >=2 grid steps (megacore) when possible
        batch_tile = 1
        for bt in range(min(B, 8), 0, -1):
            if B % bt == 0 and B // bt >= 2:
                batch_tile = bt
                break
    assert B % batch_tile == 0

    # zero-pad (1 top, 2 bottom, 1 left, 1 right) and flatten rows into lanes;
    # the extra bottom row keeps every lane-shifted conv slice in bounds.
    # x is only used as a bf16 MXU operand, so cast once here (halves HBM traffic).
    xpad = jnp.pad(x.astype(jnp.float32), ((0, 0), (0, 0), (1, 2), (1, 1)))
    xflat = xpad.reshape(B, C, Sin).astype(jnp.bfloat16)

    # lane-validity mask: lane j = r*(W+2)+c is a real pixel iff c < W
    col = jnp.arange(S, dtype=jnp.int32) % Wp
    mask = (col < W).astype(jnp.float32).reshape(1, S)

    # Fold conv1 (1x1) into the fused Q/K/V projection (exact in real arithmetic):
    #   qkv(conv1(x)) = Wqkv (W1 x + b1) + bqkv = (Wqkv W1) x + (Wqkv b1 + bqkv)
    wqkv_u = jnp.concatenate([params['wv'], params['wq'], params['wk']], axis=0)
    bqkv_u = jnp.concatenate([params['bv'], params['bq'], params['bk']], axis=0)
    wqkv = (wqkv_u @ params['w1']).astype(jnp.bfloat16)                    # (C+2Cq, C)
    bqkv = (wqkv_u @ params['b1'] + bqkv_u).reshape(-1, 1).astype(jnp.float32)

    # (O, I, 3, 3) -> (dy, dx, O, I) -> (9, O, I), tap order t = dy*3 + dx
    w2b = jnp.transpose(params['w2f'], (2, 3, 0, 1)).reshape(9, C, C).astype(jnp.bfloat16)
    b2 = params['b2f'].reshape(C, 1).astype(jnp.float32)
    gamma = params['gamma'].reshape(1, 1).astype(jnp.float32)

    args = (xflat, mask, wqkv, bqkv, w2b, b2, gamma)

    def pspec(a):
        nd = a.ndim
        return pl.BlockSpec(tuple(a.shape), lambda b, _n=nd: (0,) * _n)

    in_specs = [pl.BlockSpec((batch_tile, C, Sin), lambda b: (b, 0, 0))] + \
               [pspec(a) for a in args[1:]]
    out_specs = pl.BlockSpec((batch_tile, C, S), lambda b: (b, 0, 0))

    # explicit VMEM budget: double-buffered x/out blocks + params + headroom;
    # sized from the actual block bytes so the same plan fits v5e/v6e/v7x.
    in_block_bytes = (batch_tile * C * Sin * xflat.dtype.itemsize
                      + sum(int(a.size) * a.dtype.itemsize for a in args[1:]))
    out_block_bytes = batch_tile * C * S * 4
    vmem_limit = int(min(64 * 2**20,
                         max(8 * 2**20, 4 * (in_block_bytes + out_block_bytes))))

    kernel = functools.partial(_fem_kernel, C=C, Cq=Cq, Wp=Wp, S=S,
                               n_valid=n_valid, batch_tile=batch_tile)

    # TODO(synk): for large H*W, split into a two-pass N-tiled pipeline
    # (accumulate ksum/vsum/matrix over N-tiles, then an apply pass); the
    # full-(C, S) block per step is fine at these sizes.
    out_span = pl.pallas_call(
        kernel,
        out_shape=jax.ShapeDtypeStruct((B, C, S), jnp.float32),
        grid_spec=pltpu.PrefetchScalarGridSpec(
            num_scalar_prefetch=0,
            grid=(B // batch_tile,),
            in_specs=in_specs,
            out_specs=out_specs,
        ),
        compiler_params=pltpu.CompilerParams(
            dimension_semantics=("parallel",),
            vmem_limit_bytes=vmem_limit,
        ),
    )(*args)

    # drop the 2 pad columns per row (pure data-movement glue)
    return out_span.reshape(B, C, H, Wp)[:, :, :, :W]


def init_params(key, C):
    Cq = C // 4
    keys = jax.random.split(key, 16)

    def w(k, shape, scale=0.2):
        return (scale * jax.random.normal(k, shape)).astype(jnp.float32)

    p = dict(
        w1=w(keys[0], (C, C)), b1=w(keys[1], (C,)),
        wq=w(keys[2], (Cq, C)), bq=w(keys[3], (Cq,)),
        wk=w(keys[4], (Cq, C)), bk=w(keys[5], (Cq,)),
        wv=w(keys[6], (C, C)), bv=w(keys[7], (C,)),
        w2=w(keys[8], (C, C, 3, 3)), b2=w(keys[9], (C,)),
        bn_gamma=(1.0 + w(keys[10], (C,), 0.1)),
        bn_beta=w(keys[11], (C,), 0.1),
        bn_mean=w(keys[12], (C,), 0.1),
        bn_var=(1.0 + 0.5 * jax.random.uniform(keys[13], (C,))).astype(jnp.float32),
        # NOTE: the PyTorch module initializes Attention.gamma to zero (which
        # would zero out the whole attention branch); we pick a nonzero value
        # so the branch is numerically exercised. Weights are synthetic anyway.
        gamma=jnp.array([0.5], dtype=jnp.float32),
    )
    # Fold eval-mode BatchNorm2d into conv2's weight/bias.
    # TODO(synk): train-mode BatchNorm (batch statistics) not implemented;
    # eval-mode (running stats) is assumed and folded into the conv.
    scale = p['bn_gamma'] / jnp.sqrt(p['bn_var'] + EPS_BN)
    p['w2f'] = p['w2'] * scale[:, None, None, None]
    p['b2f'] = p['bn_beta'] + scale * (p['b2'] - p['bn_mean'])
    return p


def reference_forward(x, p, *, matmul_dtype=jnp.float32, fold_qkv=False):
    """Pure-JAX reference mirroring the PyTorch forward (NCHW).

    matmul_dtype=float32, fold_qkv=False reproduces the module's math;
    matmul_dtype=bfloat16, fold_qkv=True mirrors the kernel's math path
    (folded conv1->QKV, bf16 MXU inputs with f32 accumulation) for a tight check.
    """
    B, C, H, W = x.shape
    N = H * W
    md = matmul_dtype
    hp = lax.Precision.HIGHEST

    def conv1x1(t, w_, b_):
        y = jnp.einsum('oc,bchw->bohw', w_.astype(md), t.astype(md),
                       precision=hp, preferred_element_type=jnp.float32)
        return y + b_[None, :, None, None]

    if fold_qkv:
        wq_f, bq_f = p['wq'] @ p['w1'], p['wq'] @ p['b1'] + p['bq']
        wk_f, bk_f = p['wk'] @ p['w1'], p['wk'] @ p['b1'] + p['bk']
        wv_f, bv_f = p['wv'] @ p['w1'], p['wv'] @ p['b1'] + p['bv']
        Q = conv1x1(x, wq_f, bq_f).reshape(B, -1, N)
        K = conv1x1(x, wk_f, bk_f).reshape(B, -1, N)
        V = conv1x1(x, wv_f, bv_f).reshape(B, C, N)
    else:
        c1 = conv1x1(x, p['w1'], p['b1'])
        Q = conv1x1(c1, p['wq'], p['bq']).reshape(B, -1, N)
        K = conv1x1(c1, p['wk'], p['bk']).reshape(B, -1, N)
        V = conv1x1(c1, p['wv'], p['bv']).reshape(B, C, N)

    def l2n(t):
        return t / jnp.sqrt(jnp.sum(t * t, axis=-2, keepdims=True))

    Qn = jnp.transpose(l2n(Q), (0, 2, 1))          # (B, N, Cq)
    Kn = l2n(K)                                    # (B, Cq, N)
    tailor = 1.0 / (N + jnp.einsum('bnc,bc->bn', Qn, jnp.sum(Kn, -1) + EPS_ATTN,
                                   precision=hp))
    vsum = jnp.sum(V, -1)[:, :, None]
    matrix = jnp.einsum('bmn,bcn->bmc', Kn, V, precision=hp)
    msum = vsum + jnp.einsum('bnm,bmc->bcn', Qn, matrix, precision=hp)
    attn = (p['gamma'][0] * (msum * tailor[:, None, :])).reshape(B, C, H, W)

    c2 = lax.conv_general_dilated(
        x.astype(md), p['w2f'].astype(md), window_strides=(1, 1),
        padding=((1, 1), (1, 1)), dimension_numbers=('NCHW', 'OIHW', 'NCHW'),
        precision=hp, preferred_element_type=jnp.float32)
    c2 = c2 + p['b2f'][None, :, None, None]
    return attn + c2


if __name__ == "__main__":
    B, C, H, W = 2, 8, 16, 16
    key = jax.random.PRNGKey(0)
    kx, kp = jax.random.split(key)
    x = jax.random.normal(kx, (B, C, H, W), dtype=jnp.float32)
    params = init_params(kp, C)

    out = feature_extraction_forward(x, params)
    out = jax.block_until_ready(out)
    assert out.shape == (B, C, H, W)

    # Tight check vs a reference that mirrors the kernel's math path
    # (folded conv1->QKV, bf16 matmul inputs, f32 accumulation).
    ref_mirror = reference_forward(x, params, matmul_dtype=jnp.bfloat16,
                                   fold_qkv=True)
    assert jnp.allclose(out, ref_mirror, rtol=5e-3, atol=5e-3), \
        "mismatch vs kernel-mirroring (bf16, folded) JAX reference"

    # Loose check vs the pure-f32 PyTorch-semantics reference; tolerance
    # accounts for bf16 MXU inputs with f32 accumulation.
    ref_f32 = reference_forward(x, params, matmul_dtype=jnp.float32,
                                fold_qkv=False)
    assert jnp.allclose(out, ref_f32, rtol=2e-2, atol=2e-2), \
        "mismatch vs f32 JAX reference"

    print("KERNEL_OK")
</pallas_src>

<mosaic_0001>
module attributes {stable_mosaic.version = 11 : i64} {
  func.func @_fem_kernel(%arg0: i32, %arg1: memref<1x8x342xbf16, #tpu.memory_space<vmem>>, %arg2: memref<1x288xf32, #tpu.memory_space<vmem>>, %arg3: memref<12x8xbf16, #tpu.memory_space<vmem>>, %arg4: memref<12x1xf32, #tpu.memory_space<vmem>>, %arg5: memref<9x8x8xbf16, #tpu.memory_space<vmem>>, %arg6: memref<8x1xf32, #tpu.memory_space<vmem>>, %arg7: memref<1x1xf32, #tpu.memory_space<vmem>>, %arg8: memref<1x8x288xf32, #tpu.memory_space<vmem>>) attributes {dimension_semantics = [#tpu.dimension_semantics<parallel>], iteration_bounds = array<i64: 2>, scalar_prefetch = 0 : i64, scratch_operands = 0 : i64, tpu.core_type = #tpu.core_type<tc>, window_params = [{transform_indices = @transform_0, window_bounds = array<i64: 1, 8, 342>}, {pipeline_mode = #tpu.pipeline_mode<synchronous>, transform_indices = @transform_1, window_bounds = array<i64: 1, 288>}, {pipeline_mode = #tpu.pipeline_mode<synchronous>, transform_indices = @transform_2, window_bounds = array<i64: 12, 8>}, {pipeline_mode = #tpu.pipeline_mode<synchronous>, transform_indices = @transform_3, window_bounds = array<i64: 12, 1>}, {pipeline_mode = #tpu.pipeline_mode<synchronous>, transform_indices = @transform_4, window_bounds = array<i64: 9, 8, 8>}, {pipeline_mode = #tpu.pipeline_mode<synchronous>, transform_indices = @transform_5, window_bounds = array<i64: 8, 1>}, {pipeline_mode = #tpu.pipeline_mode<synchronous>, transform_indices = @transform_6, window_bounds = array<i64: 1, 1>}, {transform_indices = @transform_7, window_bounds = array<i64: 1, 8, 288>}]} {
    %c0 = arith.constant 0 : index
    %c0_0 = arith.constant 0 : index
    %0 = vector.load %arg2[%c0, %c0_0] : memref<1x288xf32, #tpu.memory_space<vmem>>, vector<1x288xf32>
    %cst = arith.constant 5.000000e-01 : f32
    %1 = vector.broadcast %cst : f32 to vector<1x288xf32>
    %2 = arith.cmpf ogt, %0, %1 : vector<1x288xf32>
    %c0_1 = arith.constant 0 : index
    %c0_2 = arith.constant 0 : index
    %3 = vector.load %arg3[%c0_1, %c0_2] : memref<12x8xbf16, #tpu.memory_space<vmem>>, vector<12x8xbf16>
    %c0_3 = arith.constant 0 : index
    %c0_4 = arith.constant 0 : index
    %4 = vector.load %arg4[%c0_3, %c0_4] : memref<12x1xf32, #tpu.memory_space<vmem>>, vector<12x1xf32>
    %c0_5 = arith.constant 0 : index
    %c0_6 = arith.constant 0 : index
    %5 = vector.load %arg6[%c0_5, %c0_6] : memref<8x1xf32, #tpu.memory_space<vmem>>, vector<8x1xf32>
    %c0_7 = arith.constant 0 : index
    %c0_8 = arith.constant 0 : index
    %6 = vector.load %arg7[%c0_7, %c0_8] : memref<1x1xf32, #tpu.memory_space<vmem>>, vector<1x1xf32>
    %c0_9 = arith.constant 0 : index
    %c0_10 = arith.constant 0 : index
    %c0_11 = arith.constant 0 : index
    %7 = vector.load %arg1[%c0_9, %c0_10, %c0_11] : memref<1x8x342xbf16, #tpu.memory_space<vmem>>, vector<1x8x342xbf16>
    %8 = vector.shape_cast %7 : vector<1x8x342xbf16> to vector<8x342xbf16>
    %9 = vector.extract_strided_slice %8 {offsets = [0, 0], sizes = [8, 288], strides = [1, 1]} : vector<8x342xbf16> to vector<8x288xbf16>
    %c0_12 = arith.constant 0 : index
    %c0_13 = arith.constant 0 : index
    %c0_14 = arith.constant 0 : index
    %10 = vector.load %arg5[%c0_12, %c0_13, %c0_14] : memref<9x8x8xbf16, #tpu.memory_space<vmem>>, vector<1x8x8xbf16>
    %11 = vector.shape_cast %10 : vector<1x8x8xbf16> to vector<8x8xbf16>
    %cst_15 = arith.constant dense<0.000000e+00> : vector<8x288xf32>
    %12 = tpu.matmul %11, %9, %cst_15 {dimension_numbers = #tpu.dot_dimension_numbers<[1], [0], [0], [1], [0, 0, 1, 1], [], []>} : vector<8x8xbf16>, vector<8x288xbf16>, vector<8x288xf32> -> vector<8x288xf32>
    %13 = vector.extract_strided_slice %8 {offsets = [0, 1], sizes = [8, 288], strides = [1, 1]} : vector<8x342xbf16> to vector<8x288xbf16>
    %c1 = arith.constant 1 : index
    %c0_16 = arith.constant 0 : index
    %c0_17 = arith.constant 0 : index
    %14 = vector.load %arg5[%c1, %c0_16, %c0_17] : memref<9x8x8xbf16, #tpu.memory_space<vmem>>, vector<1x8x8xbf16>
    %15 = vector.shape_cast %14 : vector<1x8x8xbf16> to vector<8x8xbf16>
    %cst_18 = arith.constant dense<0.000000e+00> : vector<8x288xf32>
    %16 = tpu.matmul %15, %13, %cst_18 {dimension_numbers = #tpu.dot_dimension_numbers<[1], [0], [0], [1], [0, 0, 1, 1], [], []>} : vector<8x8xbf16>, vector<8x288xbf16>, vector<8x288xf32> -> vector<8x288xf32>
    %17 = arith.addf %12, %16 : vector<8x288xf32>
    %18 = vector.extract_strided_slice %8 {offsets = [0, 2], sizes = [8, 288], strides = [1, 1]} : vector<8x342xbf16> to vector<8x288xbf16>
    %c2 = arith.constant 2 : index
    %c0_19 = arith.constant 0 : index
    %c0_20 = arith.constant 0 : index
    %19 = vector.load %arg5[%c2, %c0_19, %c0_20] : memref<9x8x8xbf16, #tpu.memory_space<vmem>>, vector<1x8x8xbf16>
    %20 = vector.shape_cast %19 : vector<1x8x8xbf16> to vector<8x8xbf16>
    %cst_21 = arith.constant dense<0.000000e+00> : vector<8x288xf32>
    %21 = tpu.matmul %20, %18, %cst_21 {dimension_numbers = #tpu.dot_dimension_numbers<[1], [0], [0], [1], [0, 0, 1, 1], [], []>} : vector<8x8xbf16>, vector<8x288xbf16>, vector<8x288xf32> -> vector<8x288xf32>
    %22 = arith.addf %17, %21 : vector<8x288xf32>
    %23 = vector.extract_strided_slice %8 {offsets = [0, 18], sizes = [8, 288], strides = [1, 1]} : vector<8x342xbf16> to vector<8x288xbf16>
    %c3 = arith.constant 3 : index
    %c0_22 = arith.constant 0 : index
    %c0_23 = arith.constant 0 : index
    %24 = vector.load %arg5[%c3, %c0_22, %c0_23] : memref<9x8x8xbf16, #tpu.memory_space<vmem>>, vector<1x8x8xbf16>
    %25 = vector.shape_cast %24 : vector<1x8x8xbf16> to vector<8x8xbf16>
    %cst_24 = arith.constant dense<0.000000e+00> : vector<8x288xf32>
    %26 = tpu.matmul %25, %23, %cst_24 {dimension_numbers = #tpu.dot_dimension_numbers<[1], [0], [0], [1], [0, 0, 1, 1], [], []>} : vector<8x8xbf16>, vector<8x288xbf16>, vector<8x288xf32> -> vector<8x288xf32>
    %27 = arith.addf %22, %26 : vector<8x288xf32>
    %28 = vector.extract_strided_slice %8 {offsets = [0, 19], sizes = [8, 288], strides = [1, 1]} : vector<8x342xbf16> to vector<8x288xbf16>
    %c4 = arith.constant 4 : index
    %c0_25 = arith.constant 0 : index
    %c0_26 = arith.constant 0 : index
    %29 = vector.load %arg5[%c4, %c0_25, %c0_26] : memref<9x8x8xbf16, #tpu.memory_space<vmem>>, vector<1x8x8xbf16>
    %30 = vector.shape_cast %29 : vector<1x8x8xbf16> to vector<8x8xbf16>
    %cst_27 = arith.constant dense<0.000000e+00> : vector<8x288xf32>
    %31 = tpu.matmul %30, %28, %cst_27 {dimension_numbers = #tpu.dot_dimension_numbers<[1], [0], [0], [1], [0, 0, 1, 1], [], []>} : vector<8x8xbf16>, vector<8x288xbf16>, vector<8x288xf32> -> vector<8x288xf32>
    %32 = arith.addf %27, %31 : vector<8x288xf32>
    %33 = vector.extract_strided_slice %8 {offsets = [0, 20], sizes = [8, 288], strides = [1, 1]} : vector<8x342xbf16> to vector<8x288xbf16>
    %c5 = arith.constant 5 : index
    %c0_28 = arith.constant 0 : index
    %c0_29 = arith.constant 0 : index
    %34 = vector.load %arg5[%c5, %c0_28, %c0_29] : memref<9x8x8xbf16, #tpu.memory_space<vmem>>, vector<1x8x8xbf16>
    %35 = vector.shape_cast %34 : vector<1x8x8xbf16> to vector<8x8xbf16>
    %cst_30 = arith.constant dense<0.000000e+00> : vector<8x288xf32>
    %36 = tpu.matmul %35, %33, %cst_30 {dimension_numbers = #tpu.dot_dimension_numbers<[1], [0], [0], [1], [0, 0, 1, 1], [], []>} : vector<8x8xbf16>, vector<8x288xbf16>, vector<8x288xf32> -> vector<8x288xf32>
    %37 = arith.addf %32, %36 : vector<8x288xf32>
    %38 = vector.extract_strided_slice %8 {offsets = [0, 36], sizes = [8, 288], strides = [1, 1]} : vector<8x342xbf16> to vector<8x288xbf16>
    %c6 = arith.constant 6 : index
    %c0_31 = arith.constant 0 : index
    %c0_32 = arith.constant 0 : index
    %39 = vector.load %arg5[%c6, %c0_31, %c0_32] : memref<9x8x8xbf16, #tpu.memory_space<vmem>>, vector<1x8x8xbf16>
    %40 = vector.shape_cast %39 : vector<1x8x8xbf16> to vector<8x8xbf16>
    %cst_33 = arith.constant dense<0.000000e+00> : vector<8x288xf32>
    %41 = tpu.matmul %40, %38, %cst_33 {dimension_numbers = #tpu.dot_dimension_numbers<[1], [0], [0], [1], [0, 0, 1, 1], [], []>} : vector<8x8xbf16>, vector<8x288xbf16>, vector<8x288xf32> -> vector<8x288xf32>
    %42 = arith.addf %37, %41 : vector<8x288xf32>
    %43 = vector.extract_strided_slice %8 {offsets = [0, 37], sizes = [8, 288], strides = [1, 1]} : vector<8x342xbf16> to vector<8x288xbf16>
    %c7 = arith.constant 7 : index
    %c0_34 = arith.constant 0 : index
    %c0_35 = arith.constant 0 : index
    %44 = vector.load %arg5[%c7, %c0_34, %c0_35] : memref<9x8x8xbf16, #tpu.memory_space<vmem>>, vector<1x8x8xbf16>
    %45 = vector.shape_cast %44 : vector<1x8x8xbf16> to vector<8x8xbf16>
    %cst_36 = arith.constant dense<0.000000e+00> : vector<8x288xf32>
    %46 = tpu.matmul %45, %43, %cst_36 {dimension_numbers = #tpu.dot_dimension_numbers<[1], [0], [0], [1], [0, 0, 1, 1], [], []>} : vector<8x8xbf16>, vector<8x288xbf16>, vector<8x288xf32> -> vector<8x288xf32>
    %47 = arith.addf %42, %46 : vector<8x288xf32>
    %48 = vector.extract_strided_slice %8 {offsets = [0, 38], sizes = [8, 288], strides = [1, 1]} : vector<8x342xbf16> to vector<8x288xbf16>
    %c8 = arith.constant 8 : index
    %c0_37 = arith.constant 0 : index
    %c0_38 = arith.constant 0 : index
    %49 = vector.load %arg5[%c8, %c0_37, %c0_38] : memref<9x8x8xbf16, #tpu.memory_space<vmem>>, vector<1x8x8xbf16>
    %50 = vector.shape_cast %49 : vector<1x8x8xbf16> to vector<8x8xbf16>
    %cst_39 = arith.constant dense<0.000000e+00> : vector<8x288xf32>
    %51 = tpu.matmul %50, %48, %cst_39 {dimension_numbers = #tpu.dot_dimension_numbers<[1], [0], [0], [1], [0, 0, 1, 1], [], []>} : vector<8x8xbf16>, vector<8x288xbf16>, vector<8x288xf32> -> vector<8x288xf32>
    %52 = arith.addf %47, %51 : vector<8x288xf32>
    %53 = vector.broadcast %5 : vector<8x1xf32> to vector<8x288xf32>
    %54 = arith.addf %52, %53 : vector<8x288xf32>
    %55 = vector.extract_strided_slice %8 {offsets = [0, 19], sizes = [8, 288], strides = [1, 1]} : vector<8x342xbf16> to vector<8x288xbf16>
    %cst_40 = arith.constant dense<0.000000e+00> : vector<12x288xf32>
    %56 = tpu.matmul %3, %55, %cst_40 {dimension_numbers = #tpu.dot_dimension_numbers<[1], [0], [0], [1], [0, 0, 1, 1], [], []>} : vector<12x8xbf16>, vector<8x288xbf16>, vector<12x288xf32> -> vector<12x288xf32>
    %57 = vector.broadcast %4 : vector<12x1xf32> to vector<12x288xf32>
    %58 = arith.addf %56, %57 : vector<12x288xf32>
    %59 = vector.extract_strided_slice %58 {offsets = [0, 0], sizes = [8, 288], strides = [1, 1]} : vector<12x288xf32> to vector<8x288xf32>
    %60 = vector.extract_strided_slice %58 {offsets = [8, 0], sizes = [2, 288], strides = [1, 1]} : vector<12x288xf32> to vector<2x288xf32>
    %61 = vector.extract_strided_slice %58 {offsets = [10, 0], sizes = [2, 288], strides = [1, 1]} : vector<12x288xf32> to vector<2x288xf32>
    %62 = arith.mulf %60, %60 : vector<2x288xf32>
    %cst_41 = arith.constant dense<0.000000e+00> : vector<288xf32>
    %63 = vector.multi_reduction <add>, %62, %cst_41 [0] : vector<2x288xf32> to vector<288xf32>
    %64 = vector.shape_cast %63 : vector<288xf32> to vector<1x288xf32>
    %65 = math.rsqrt %64 : vector<1x288xf32>
    %66 = vector.broadcast %65 : vector<1x288xf32> to vector<2x288xf32>
    %67 = arith.mulf %60, %66 : vector<2x288xf32>
    %68 = arith.mulf %61, %61 : vector<2x288xf32>
    %cst_42 = arith.constant dense<0.000000e+00> : vector<288xf32>
    %69 = vector.multi_reduction <add>, %68, %cst_42 [0] : vector<2x288xf32> to vector<288xf32>
    %70 = vector.shape_cast %69 : vector<288xf32> to vector<1x288xf32>
    %71 = math.rsqrt %70 : vector<1x288xf32>
    %72 = vector.broadcast %71 : vector<1x288xf32> to vector<2x288xf32>
    %73 = arith.mulf %61, %72 : vector<2x288xf32>
    %cst_43 = arith.constant 0.000000e+00 : f32
    %74 = vector.shape_cast %2 : vector<1x288xi1> to vector<1x288xi1>
    %75 = vector.broadcast %74 : vector<1x288xi1> to vector<2x288xi1>
    %76 = vector.broadcast %cst_43 : f32 to vector<2x288xf32>
    %77 = arith.select %75, %73, %76 : vector<2x288xi1>, vector<2x288xf32>
    %cst_44 = arith.constant 0.000000e+00 : f32
    %78 = vector.shape_cast %2 : vector<1x288xi1> to vector<1x288xi1>
    %79 = vector.broadcast %78 : vector<1x288xi1> to vector<8x288xi1>
    %80 = vector.broadcast %cst_44 : f32 to vector<8x288xf32>
    %81 = arith.select %79, %59, %80 : vector<8x288xi1>, vector<8x288xf32>
    %cst_45 = arith.constant dense<0.000000e+00> : vector<2xf32>
    %82 = vector.multi_reduction <add>, %77, %cst_45 [1] : vector<2x288xf32> to vector<2xf32>
    %83 = vector.shape_cast %82 : vector<2xf32> to vector<2x1xf32>
    %cst_46 = arith.constant 9.99999997E-7 : f32
    %84 = vector.broadcast %cst_46 : f32 to vector<2x1xf32>
    %85 = arith.addf %83, %84 : vector<2x1xf32>
    %86 = vector.broadcast %85 : vector<2x1xf32> to vector<2x288xf32>
    %87 = arith.mulf %67, %86 : vector<2x288xf32>
    %cst_47 = arith.constant dense<0.000000e+00> : vector<288xf32>
    %88 = vector.multi_reduction <add>, %87, %cst_47 [0] : vector<2x288xf32> to vector<288xf32>
    %89 = vector.shape_cast %88 : vector<288xf32> to vector<1x288xf32>
    %cst_48 = arith.constant 2.560000e+02 : f32
    %90 = vector.broadcast %cst_48 : f32 to vector<1x288xf32>
    %91 = arith.addf %90, %89 : vector<1x288xf32>
    %92 = tpu.reciprocal %91 {approx = true} : vector<1x288xf32> -> vector<1x288xf32>
    %cst_49 = arith.constant dense<0.000000e+00> : vector<8xf32>
    %93 = vector.multi_reduction <add>, %81, %cst_49 [1] : vector<8x288xf32> to vector<8xf32>
    %94 = vector.shape_cast %93 : vector<8xf32> to vector<8x1xf32>
    %cst_50 = arith.constant dense<0.000000e+00> : vector<8x2xf32>
    %95 = tpu.matmul %81, %77, %cst_50 {dimension_numbers = #tpu.dot_dimension_numbers<[1], [1], [0], [0], [0, 0, 1, 0], [], []>} : vector<8x288xf32>, vector<2x288xf32>, vector<8x2xf32> -> vector<8x2xf32>
    %cst_51 = arith.constant dense<0.000000e+00> : vector<8x288xf32>
    %96 = tpu.matmul %95, %67, %cst_51 {dimension_numbers = #tpu.dot_dimension_numbers<[1], [0], [0], [1], [0, 0, 1, 1], [], []>} : vector<8x2xf32>, vector<2x288xf32>, vector<8x288xf32> -> vector<8x288xf32>
    %97 = vector.broadcast %94 : vector<8x1xf32> to vector<8x288xf32>
    %98 = arith.addf %97, %96 : vector<8x288xf32>
    %99 = vector.broadcast %92 : vector<1x288xf32> to vector<8x288xf32>
    %100 = arith.mulf %98, %99 : vector<8x288xf32>
    %101 = vector.broadcast %6 : vector<1x1xf32> to vector<8x288xf32>
    %102 = arith.mulf %101, %100 : vector<8x288xf32>
    %103 = arith.addf %102, %54 : vector<8x288xf32>
    %c0_52 = arith.constant 0 : index
    %c0_53 = arith.constant 0 : index
    %c0_54 = arith.constant 0 : index
    %104 = vector.load %arg8[%c0_52, %c0_53, %c0_54] : memref<1x8x288xf32, #tpu.memory_space<vmem>>, vector<1x8x288xf32>
    %105 = vector.shape_cast %104 : vector<1x8x288xf32> to vector<8x288xf32>
    %106 = vector.shape_cast %103 : vector<8x288xf32> to vector<1x8x288xf32>
    tpu.vector_store %arg8[%c0_52, %c0_53, %c0_54], %106 {strides = array<i32>} : memref<1x8x288xf32, #tpu.memory_space<vmem>>, vector<1x8x288xf32>,
    return
  }
  func.func @transform_0(%arg0: i32) -> (i32, i32, i32) {
    %c0_i32 = arith.constant 0 : i32
    %c0_i32_0 = arith.constant 0 : i32
    %c0_i32_1 = arith.constant 0 : i32
    return %arg0, %c0_i32, %c0_i32_0 : i32, i32, i32
  }
  func.func @transform_1(%arg0: i32) -> (i32, i32) {
    %c0_i32 = arith.constant 0 : i32
    %c0_i32_0 = arith.constant 0 : i32
    %c0_i32_1 = arith.constant 0 : i32
    return %c0_i32, %c0_i32_0 : i32, i32
  }
  func.func @transform_2(%arg0: i32) -> (i32, i32) {
    %c0_i32 = arith.constant 0 : i32
    %c0_i32_0 = arith.constant 0 : i32
    %c0_i32_1 = arith.constant 0 : i32
    return %c0_i32, %c0_i32_0 : i32, i32
  }
  func.func @transform_3(%arg0: i32) -> (i32, i32) {
    %c0_i32 = arith.constant 0 : i32
    %c0_i32_0 = arith.constant 0 : i32
    %c0_i32_1 = arith.constant 0 : i32
    return %c0_i32, %c0_i32_0 : i32, i32
  }
  func.func @transform_4(%arg0: i32) -> (i32, i32, i32) {
    %c0_i32 = arith.constant 0 : i32
    %c0_i32_0 = arith.constant 0 : i32
    %c0_i32_1 = arith.constant 0 : i32
    %c0_i32_2 = arith.constant 0 : i32
    return %c0_i32, %c0_i32_0, %c0_i32_1 : i32, i32, i32
  }
  func.func @transform_5(%arg0: i32) -> (i32, i32) {
    %c0_i32 = arith.constant 0 : i32
    %c0_i32_0 = arith.constant 0 : i32
    %c0_i32_1 = arith.constant 0 : i32
    return %c0_i32, %c0_i32_0 : i32, i32
  }
  func.func @transform_6(%arg0: i32) -> (i32, i32) {
    %c0_i32 = arith.constant 0 : i32
    %c0_i32_0 = arith.constant 0 : i32
    %c0_i32_1 = arith.constant 0 : i32
    return %c0_i32, %c0_i32_0 : i32, i32
  }
  func.func @transform_7(%arg0: i32) -> (i32, i32, i32) {
    %c0_i32 = arith.constant 0 : i32
    %c0_i32_0 = arith.constant 0 : i32
    %c0_i32_1 = arith.constant 0 : i32
    return %arg0, %c0_i32, %c0_i32_0 : i32, i32, i32
  }
}

</mosaic_0001>

<bundles_post_ra>
// kernel: tpu_custom_call.1
= control target key start
LH: loop header
LB: loop body
LE: loop exit
PB: predicated region body
PF: predicated region fallthrough
CT: control target
= control target key end

     0   :  { %s2587_s0 = inlined_call_operand.vmem [shape: bf16[2,8,342], index: 0, kind: input, shape index: {}]   ;;  %s2588_s1 = inlined_call_operand.vmem [shape: f32[1,288], index: 1, kind: input, shape index: {}]   ;;  %s2589_s2 = inlined_call_operand.vmem [shape: bf16[12,8], index: 2, kind: input, shape index: {}]   ;;  %s2590_s3 = inlined_call_operand.vmem [shape: f32[12,1], index: 3, kind: input, shape index: {}]   ;;  %s2591_s4 = inlined_call_operand.vmem [shape: bf16[9,8,8], index: 4, kind: input, shape index: {}]   ;;  %s2592_s5 = inlined_call_operand.vmem [shape: f32[8,1], index: 5, kind: input, shape index: {}]   ;;  %s2593_s6 = inlined_call_operand.<no memory space> [shape: f32[1,1], index: 6, kind: input, shape index: {}]   ;;  %s2594_s7 = inlined_call_operand.hbm [shape: f32[2,8,288], index: 7, kind: output, shape index: {}]  }
   0x1   :  { %v12_v0 = vstv %s2593_s6 }
   0x2   :  { %13 = vst [vmem:[#allocation2] sm:$0x1] %v12_v0 }
   0x3   :  { %14 = vsyncpa [#allocation4], 0 }
   0x4   :  { %16 = vsyncpa [#allocation4 + $0x1], 0  ;;  %s2253_s26 = smov 0   ;;  %s2255_s27 = smov 0  }
   0x5   :  { %s2257_s28 = smov 0   ;;  %s2259_s29 = smov 0  }
   0x6 LB: > { %s2274_s6 = sadd.s32 4294967295, %s2196_s29   ;;  %s1901_s30 = sadd.s32 4294967294, %s2196_s29   ;;  %s2196_s29 = sphi %s2259_s29, %s2600_s29   ;;  %s2192_s28 = sphi %s2257_s28, %s2599_s28   ;;  %s2188_s27 = sphi %s2255_s27, %s2598_s27   ;;  %s2184_s26 = sphi %s2253_s26, %s2597_s26  }
   0x7   : > { %s2278_s8 = sadd.s32 1, %s2196_s29   ;;  %s181_s9 = sadd.s32 1, %s2192_s28 }
   0x8   : > { %s178_s10 = ssub.s32 %s2196_s29, %s2278_s8  ;;  %p191_p0 = scmp.ne.s32.totalorder %s2192_s28, %s2188_s27 }
   0x9   : > { %p179_p1 = scmp.eq.s32.totalorder %s178_s10, 0  ;;  %p192_p2 = scmp.eq.s32.totalorder %s2274_s6, 1 }
   0xa   : > { %p197_p3 = scmp.ne.s32.totalorder %s2188_s27, %s2184_s26  ;;  %p198_p4 = scmp.eq.s32.totalorder %s1901_s30, 1 }
   0xb   : > { %s2289_s11 = scalar_select %p179_p1, %s2192_s28, %s181_s9  }
   0xc   : > { %p2291_p5 = por %p192_p2, %p191_p0  ;;  %p2295_p6 = por %p198_p4, %p197_p3 }
   0xd   : > { %p1904_p7 = scmp.ge.s32.totalorder %s2196_s29, 1  ;;  %p242_p8 = scmp.lt.s32.totalorder %s2196_s29, 3 }
   0xf   : > { %p243_p9 = pnand %p1904_p7, %p242_p8 }
  0x10   : > { %p274_p10 = scmp.lt.s32.totalorder (!%p243_p9), %s2274_s6, 1  ;;  %v2198_v1 = vmov (!%p243_p9), 0.0   ;;  %vm2199_vm0 = vmmov (!%p243_p9), 0   ;;  %v2200_v2 = vmov (!%p243_p9), 0   ;;  %s2201_s19 = smov (!%p243_p9), 127   ;;  %v284_v8 = vld [vmem:[%s2590_s3] sm:$0xff] (!%p243_p9) }
  0x11   : > { %246 = sbr.rel (%p243_p9) target bundleno = 942 (0x3ae), region = 48  ;;  %1985 = vmatprep.subr.bf16.mxu1 (!%p243_p9), %v2198_v1  ;;  %1987 = vmatprep.mubr.msk.bf16.mxu1 (!%p243_p9), %vm2199_vm0, %v2198_v1  ;;  %s2202_s20 = smov (!%p243_p9), 126   ;;  %v285_v7 = vld [vmem:[%s2590_s3 + $0x8] sm:$0xf] (!%p243_p9)  ;;  %vm314_vm1 = vcmask (!%p243_p9), 1043456   ;;  %vm310_vm2 = vcmask (!%p243_p9), 64512  }
  0x12   : > { %356 = vmatprep.mubr.bf16.mxu0 (!%p243_p9), %v2200_v2  ;;  %2110 = vset.pattern.permute.xlu0 (!%p243_p9), %v2200_v2  ;;  %s2203_s21 = smov (!%p243_p9), 110   ;;  %s2204_s22 = smov (!%p243_p9), 109   ;;  %v1906_v12 = vld [vmem:[%s2591_s4 + $0x4] sm:$0xf] (!%p243_p9)  ;;  %vm307_vm3 = vcmask (!%p243_p9), 1039360   ;;  %vm506_vm4 = vcmask (!%p243_p9), 1031168  }
  0x13   : > { %2111 = vset.pattern.permute.xlu1 (!%p243_p9), %v2200_v2  ;;  %s2205_s23 = smov (!%p243_p9), 108   ;;  %s2206_s24 = smov (!%p243_p9), 92   ;;  %v290_v22 = vld [vmem:[%s2591_s4] sm:$0xf] (!%p243_p9)  ;;  %vm613_vm5 = vcmask (!%p243_p9), 900096   ;;  %vm720_vm6 = vcmask (!%p243_p9), 891904  }
  0x14   : > { %s2207_s25 = smov (!%p243_p9), 91   ;;  %s2208_s30 = smov (!%p243_p9), 90   ;;  %v1916_v31 = vld [vmem:[%s2591_s4 + $0x8] sm:$0xf] (!%p243_p9)  ;;  %v1920_v39 = vld [vmem:[%s2591_s4 + $0xc] sm:$0xf] (!%p243_p9) }
  0x15   : > { %vm827_vm7 = vcmask (!%p243_p9), 883712   ;;  %v1924_v47 = vld [vmem:[%s2591_s4 + $0x10] sm:$0xf] (!%p243_p9)  ;;  %vm934_vm8 = vcmask (!%p243_p9), 752640   ;;  %v1928_v55 = vld [vmem:[%s2591_s4 + $0x14] sm:$0xf] (!%p243_p9) }
  0x16   : > { %vm1041_vm9 = vcmask (!%p243_p9), 744448   ;;  %v1932_v63 = vld [vmem:[%s2591_s4 + $0x18] sm:$0xf] (!%p243_p9)  ;;  %vm1148_vm10 = vcmask (!%p243_p9), 736256   ;;  %vm1375_vm13 = vcmask (!%p243_p9), 254976   ;;  %vm1491_vm15 = vcmask (!%p243_p9), 261120  }
  0x17   : > { %s2059_s9 = smul.u32 (!%p243_p9), 384, %s2274_s6 }
  0x18   : > { %s275_s14 = scalar_select %p274_p10, %s2274_s6, 1 }
  0x19   : > { %s2542_s17 = scalar_lea.hbm %s2594_s7, %s2059_s9 }
  0x1a   : > { %s2058_s15 = smul.u32 12, %s275_s14 }
  0x1c   : > { %s278_s18 = scalar_lea.vmem %s2587_s0, %s2058_s15 }
  0x1d   : > { %v2112_v3 = vld [vmem:[%s278_s18 + $0x8] ss:$0 sps:$4 sm:$0xff]   ;;  %v288_v4 = vld [vmem:[%s278_s18] sm:$0xff] }
  0x1e   : > { %v1907_v5 = vcombine.low %v288_v4, %v288_v4  ;;  %305 = vrot.lane.b32.xlu1 %v2112_v3, %s2201_s19  ;;  %v1908_v6 = vcombine.high %v288_v4, %v288_v4  ;;  %v415_v13 = vsel %vm314_vm1, %v2112_v3, 0 }
  0x20   : > { %301 = vrot.lane.b32.xlu0 %v1907_v5, %s2201_s19  ;;  %v409_v20 = vsel %vm314_vm1, %v1907_v5, 0 }
  0x22   : > { %500 = vrot.lane.b32.xlu1 %v1907_v5, %s2202_s20 }
  0x24   : > { %303 = vrot.lane.b32.xlu0 %v1908_v6, %s2201_s19  ;;  %s2209_s19 = smov [#allocation3]  }
  0x26   : > { %504 = vrot.lane.b32.xlu1 %v2112_v3, %s2202_s20 }
  0x28   : > { %502 = vrot.lane.b32.xlu0 %v1908_v6, %s2202_s20  ;;  %s2138_s20 = sshll.u32 %s2209_s19, 4  ;;  %s2139_s20 = int_to_ptr.vmem [resolvable:$false] %s2138_s20 }
  0x2a   : > { %609 = vrot.lane.b32.xlu1 %v1908_v6, %s2203_s21 }
  0x2c   : > { %607 = vrot.lane.b32.xlu0 %v1907_v5, %s2203_s21 }
  0x2e   : > { %714 = vrot.lane.b32.xlu1 %v1907_v5, %s2204_s22 }
  0x30   : > { %611 = vrot.lane.b32.xlu0 %v2112_v3, %s2203_s21  ;;  %s2140_s21 = scalar_lea.vmem %s2139_s20, 768 }
  0x32   : > { %718 = vrot.lane.b32.xlu1 %v2112_v3, %s2204_s22 }
  0x34   : > { %716 = vrot.lane.b32.xlu0 %v1908_v6, %s2204_s22 }
  0x36   : > { %823 = vrot.lane.b32.xlu1 %v1908_v6, %s2205_s23 }
  0x38   : > { %821 = vrot.lane.b32.xlu0 %v1907_v5, %s2205_s23 }
  0x3a   : > { %928 = vrot.lane.b32.xlu1 %v1907_v5, %s2206_s24 }
  0x3c   : > { %825 = vrot.lane.b32.xlu0 %v2112_v3, %s2205_s23 }
  0x3e   : > { %932 = vrot.lane.b32.xlu1 %v2112_v3, %s2206_s24 }
  0x40   : > { %930 = vrot.lane.b32.xlu0 %v1908_v6, %s2206_s24 }
  0x42   : > { %1037 = vrot.lane.b32.xlu1 %v1908_v6, %s2207_s25 }
  0x44   : > { %1035 = vrot.lane.b32.xlu0 %v1907_v5, %s2207_s25 }
  0x46   : > { %1142 = vrot.lane.b32.xlu1 %v1907_v5, %s2208_s30 }
  0x48   : > { %1039 = vrot.lane.b32.xlu0 %v2112_v3, %s2207_s25  ;;  %s271_s25 = sand.u32 1, %s2188_s27  }
  0x49   : > { %s1828_s6 = scalar_lea.sflag [#allocation4], %s271_s25 }
  0x4a   : > { %1146 = vrot.lane.b32.xlu1 %v2112_v3, %s2208_s30 }
  0x4c   : > { %1144 = vrot.lane.b32.xlu0 %v1908_v6, %s2208_s30  ;;  %s2057_s30 = smul.u32 24, %s271_s25 }
  0x4e   : > { %1257 = vperm.xlu1 %2111, %v284_v8   ;;  %v1936_v8 = vld [vmem:[%s2591_s4 + $0x1c] sm:$0xf]  ;;  %s273_s10 = scalar_lea.vmem [#allocation3], %s2057_s30 }
  0x4f   : > { %s1842_s14 = sshll.u32 %s273_s10, 4  ;;  %s2544_s14 = int_to_ptr.vmem [resolvable:$true] %s1842_s14 }
  0x50   : > { %1262 = vperm.xlu0 %2110, %v285_v7   ;;  %s2134_s18 = scalar_lea.vmem %s2544_s14, 384  ;;  %p2141_p0 = scmp.lt.s32.totalorder %s2544_s14, %s2139_s20 }
  0x51   : > { %p2135_p11 = scmp.ne.s32.totalorder %s2544_s14, %s2134_s18  ;;  %p2142_p1 = scmp.lt.s32.totalorder %s2140_s21, %s2134_s18 }
  0x53   : > { %p2136_p12 = pnand %p2135_p11, %p2291_p5  ;;  %p2143_p2 = por %p2142_p1, %p2141_p0 }
  0x55   : > { %p2137_p13 = pneg %p2136_p12 }
  0x57   : > { %p2144_p3 = pnand %p2143_p2, %p2137_p13 }
  0x90   : > { %v306_v9 = vpop.permute.xlu1 %305 }
  0x91   : > { %v322_v11 = vsel %vm314_vm1, %v306_v9, 0 }
  0x92   : > { %v302_v10 = vpop.permute.xlu0 %301  ;;  %1986 = vmatpush3.bf16.msra.mxu1 %v322_v11 }
  0x93   : > { %1991 = vmatprep.subr.bf16.mxu1 %v2198_v1 }
  0x94   : > { %v501_v14 = vpop.permute.xlu1 %500 }
  0x95   : > { %1988 = vmatmul.mubr.msk.bf16.vlgmr.msra.gmra.mrb[0].mxu1 %vm310_vm2, %v1906_v12 }
  0x96   : > { %v304_v15 = vpop.permute.xlu0 %303  ;;  %1992 = vmatpush3.bf16.msra.mxu1 %v415_v13  ;;  %1993 = vmatprep.mubr.msk.bf16.mxu1 %vm2199_vm0, %v2198_v1  ;;  %v1940_v13 = vld [vmem:[%s2591_s4 + $0x20] sm:$0xf] }
  0x97   : > { %v309_v16 = vsel %vm307_vm3, %v304_v15, %v306_v9  ;;  %v308_v17 = vsel %vm307_vm3, %v302_v10, %v304_v15  ;;  %1997 = vmatprep.subr.bf16.mxu1 %v2198_v1  ;;  %vm1447_vm3 = vcmask 1043458  }
  0x98   : > { %1910 = vmatprep.subr.msk.bf16.mxu0 %vm314_vm1, %v309_v16  ;;  %v316_v18 = vsel %vm314_vm1, %v308_v17, 0  ;;  %v505_v19 = vpop.permute.xlu1 %504 }
  0x99   : > { %325 = vmatpush1.bf16.msra.mxu0 %v316_v18  ;;  %v519_v24 = vsel %vm314_vm1, %v505_v19, 0 }
  0x9a   : > { %1913 = vmatprep.subr.msk.bf16.mxu0 %vm314_vm1, %v1908_v6  ;;  %v503_v21 = vpop.permute.xlu0 %502 }
  0x9b   : > { %v508_v23 = vsel %vm506_vm4, %v503_v21, %v505_v19  ;;  %v507_v27 = vsel %vm506_vm4, %v501_v14, %v503_v21  ;;  %v2115_v14 = vld [vmem:[%s2589_s2] sm:$0x3f]   ;;  %vm1451_vm4 = vcmask 257026  }
  0x9c   : > { %1911 = vmatmul.mubr.msk.bf16.vlgmr.msra.gmra.mrb[0].mxu0 %vm310_vm2, %v1906_v12  ;;  %v610_v25 = vpop.permute.xlu1 %609  ;;  %v513_v28 = vsel %vm314_vm1, %v507_v27, 0 }
  0x9d   : > { %418 = vmatpush1.bf16.msra.mxu0 %v409_v20  ;;  %449 = vmatprep.mubr.bf16.mxu0 %v2200_v2 }
  0x9e   : > { %1994 = vmatmul.mubr.msk.bf16.vlgmr.msra.gmra.mrb[4].mxu1 %vm310_vm2, %v290_v22  ;;  %1917 = vmatprep.subr.msk.bf16.mxu0 %vm314_vm1, %v508_v23  ;;  %v608_v26 = vpop.permute.xlu0 %607 }
  0x9f   : > { %1998 = vmatpush3.bf16.msra.mxu1 %v519_v24  ;;  %1999 = vmatprep.mubr.msk.bf16.mxu1 %vm2199_vm0, %v2198_v1  ;;  %v614_v35 = vsel %vm613_vm5, %v608_v26, %v610_v25 }
  0xa0   : > { %2003 = vmatprep.subr.bf16.mxu1 %v2198_v1  ;;  %v715_v30 = vpop.permute.xlu1 %714  ;;  %v620_v37 = vsel %vm314_vm1, %v614_v35, 0 }
  0xa2   : > { %v612_v29 = vpop.permute.xlu0 %611 }
  0xa3   : > { %v615_v32 = vsel %vm613_vm5, %v610_v25, %v612_v29  ;;  %v626_v33 = vsel %vm314_vm1, %v612_v29, 0  ;;  %vm1649_vm5 = vcmask 15360  }
  0xa4   : > { %1914 = vmatmul.mubr.msk.bf16.vlgmr.msra.gmra.mrb[4].mxu0 %vm310_vm2, %v290_v22  ;;  %v719_v36 = vpop.permute.xlu1 %718 }
  0xa5   : > { %522 = vmatpush1.bf16.msra.mxu0 %v513_v28  ;;  %553 = vmatprep.mubr.bf16.mxu0 %v2200_v2  ;;  %v2365_v41 = vsel %vm314_vm1, %v719_v36, 0 }
  0xa6   : > { %2000 = vmatmul.mubr.msk.bf16.vlgmr.msra.gmra.mrb[8].mxu1 %vm310_vm2, %v1916_v31  ;;  %1921 = vmatprep.subr.msk.bf16.mxu0 %vm314_vm1, %v615_v32  ;;  %v717_v34 = vpop.permute.xlu0 %716 }
  0xa7   : > { %2004 = vmatpush3.bf16.msra.mxu1 %v626_v33  ;;  %2005 = vmatprep.mubr.msk.bf16.mxu1 %vm2199_vm0, %v2198_v1  ;;  %v2361_v40 = vsel %vm720_vm6, %v717_v34, %v719_v36  ;;  %v721_v43 = vsel %vm720_vm6, %v715_v30, %v717_v34 }
  0xa8   : > { %2009 = vmatprep.subr.bf16.mxu1 %v2198_v1  ;;  %v824_v42 = vpop.permute.xlu1 %823  ;;  %v2376_v45 = vsel %vm314_vm1, %v721_v43, 0 }
  0xaa   : > { %v822_v38 = vpop.permute.xlu0 %821 }
  0xab   : > { %v828_v51 = vsel %vm827_vm7, %v822_v38, %v824_v42 }
  0xac   : > { %1918 = vmatmul.mubr.msk.bf16.vlgmr.msra.gmra.mrb[8].mxu0 %vm310_vm2, %v1916_v31  ;;  %v929_v46 = vpop.permute.xlu1 %928  ;;  %v834_v53 = vsel %vm314_vm1, %v828_v51, 0 }
  0xad   : > { %629 = vmatpush1.bf16.msra.mxu0 %v620_v37  ;;  %660 = vmatprep.mubr.bf16.mxu0 %v2200_v2 }
  0xae   : > { %2006 = vmatmul.mubr.msk.bf16.vlgmr.msra.gmra.mrb[12].mxu1 %vm310_vm2, %v1920_v39  ;;  %1925 = vmatprep.subr.msk.bf16.mxu0 %vm314_vm1, %v2361_v40  ;;  %v826_v44 = vpop.permute.xlu0 %825 }
  0xaf   : > { %2010 = vmatpush3.bf16.msra.mxu1 %v2365_v41  ;;  %2011 = vmatprep.mubr.msk.bf16.mxu1 %vm2199_vm0, %v2198_v1  ;;  %v829_v48 = vsel %vm827_vm7, %v824_v42, %v826_v44  ;;  %v840_v49 = vsel %vm314_vm1, %v826_v44, 0 }
  0xb0   : > { %2015 = vmatprep.subr.bf16.mxu1 %v2198_v1  ;;  %v933_v52 = vpop.permute.xlu1 %932 }
  0xb1   : > { %v947_v57 = vsel %vm314_vm1, %v933_v52, 0 }
  0xb2   : > { %v931_v50 = vpop.permute.xlu0 %930 }
  0xb3   : > { %v936_v56 = vsel %vm934_vm8, %v931_v50, %v933_v52  ;;  %v935_v59 = vsel %vm934_vm8, %v929_v46, %v931_v50 }
  0xb4   : > { %1922 = vmatmul.mubr.msk.bf16.vlgmr.msra.gmra.mrb[12].mxu0 %vm310_vm2, %v1920_v39  ;;  %v1038_v58 = vpop.permute.xlu1 %1037  ;;  %v941_v61 = vsel %vm314_vm1, %v935_v59, 0 }
  0xb5   : > { %736 = vmatpush1.bf16.msra.mxu0 %v2376_v45  ;;  %767 = vmatprep.mubr.bf16.mxu0 %v2200_v2 }
  0xb6   : > { %2012 = vmatmul.mubr.msk.bf16.vlgmr.msra.gmra.mrb[16].mxu1 %vm310_vm2, %v1924_v47  ;;  %1929 = vmatprep.subr.msk.bf16.mxu0 %vm314_vm1, %v829_v48  ;;  %v1036_v54 = vpop.permute.xlu0 %1035 }
  0xb7   : > { %2016 = vmatpush3.bf16.msra.mxu1 %v840_v49  ;;  %2017 = vmatprep.mubr.msk.bf16.mxu1 %vm2199_vm0, %v2198_v1  ;;  %v1042_v4 = vsel %vm1041_vm9, %v1036_v54, %v1038_v58 }
  0xb8   : > { %2021 = vmatprep.subr.bf16.mxu1 %v2198_v1  ;;  %v1143_v62 = vpop.permute.xlu1 %1142  ;;  %v1048_v7 = vsel %vm314_vm1, %v1042_v4, 0 }
  0xba   : > { %v1040_v60 = vpop.permute.xlu0 %1039 }
  0xbb   : > { %v1043_v0 = vsel %vm1041_vm9, %v1038_v58, %v1040_v60  ;;  %v1054_v3 = vsel %vm314_vm1, %v1040_v60, 0 }
  0xbc   : > { %1926 = vmatmul.mubr.msk.bf16.vlgmr.msra.gmra.mrb[16].mxu0 %vm310_vm2, %v1924_v47  ;;  %v1147_v5 = vpop.permute.xlu1 %1146 }
  0xbd   : > { %843 = vmatpush1.bf16.msra.mxu0 %v834_v53  ;;  %874 = vmatprep.mubr.bf16.mxu0 %v2200_v2  ;;  %v1161_v10 = vsel %vm314_vm1, %v1147_v5, 0 }
  0xbe   : > { %2018 = vmatmul.mubr.msk.bf16.vlgmr.msra.gmra.mrb[20].mxu1 %vm310_vm2, %v1928_v55  ;;  %1933 = vmatprep.subr.msk.bf16.mxu0 %vm314_vm1, %v936_v56  ;;  %v1145_v6 = vpop.permute.xlu0 %1144 }
  0xbf   : > { %2022 = vmatpush3.bf16.msra.mxu1 %v947_v57  ;;  %2023 = vmatprep.mubr.msk.bf16.mxu1 %vm2199_vm0, %v2198_v1  ;;  %v1150_v9 = vsel %vm1148_vm10, %v1145_v6, %v1147_v5  ;;  %v1149_v11 = vsel %vm1148_vm10, %v1143_v62, %v1145_v6 }
  0xc0   : > { %2027 = vmatprep.subr.bf16.mxu1 %v2198_v1  ;;  %v1155_v12 = vsel %vm314_vm1, %v1149_v11, 0 }
  0xc4   : > { %1930 = vmatmul.mubr.msk.bf16.vlgmr.msra.gmra.mrb[20].mxu0 %vm310_vm2, %v1928_v55 }
  0xc5   : > { %950 = vmatpush1.bf16.msra.mxu0 %v941_v61  ;;  %981 = vmatprep.mubr.bf16.mxu0 %v2200_v2 }
  0xc6   : > { %2024 = vmatmul.mubr.msk.bf16.vlgmr.msra.gmra.mrb[24].mxu1 %vm310_vm2, %v1932_v63  ;;  %1937 = vmatprep.subr.msk.bf16.mxu0 %vm314_vm1, %v1043_v0 }
  0xc7   : > { %2028 = vmatpush3.bf16.msra.mxu1 %v1054_v3  ;;  %2029 = vmatprep.mubr.msk.bf16.mxu1 %vm2199_vm0, %v2198_v1 }
  0xc8   : > { %2033 = vmatprep.subr.bf16.mxu1 %v2198_v1 }
  0xcc   : > { %1934 = vmatmul.mubr.msk.bf16.vlgmr.msra.gmra.mrb[24].mxu0 %vm310_vm2, %v1932_v63 }
  0xcd   : > { %1057 = vmatpush1.bf16.msra.mxu0 %v1048_v7  ;;  %1088 = vmatprep.mubr.bf16.mxu0 %v2200_v2 }
  0xce   : > { %2030 = vmatmul.mubr.msk.bf16.vlgmr.msra.gmra.mrb[28].mxu1 %vm310_vm2, %v1936_v8  ;;  %1941 = vmatprep.subr.msk.bf16.mxu0 %vm314_vm1, %v1150_v9 }
  0xcf   : > { %2034 = vmatpush3.bf16.msra.mxu1 %v1161_v10  ;;  %2035 = vmatprep.mubr.msk.bf16.mxu1 %vm2199_vm0, %v2198_v1 }
  0xd0   : > { %2039 = vmatprep.subr.bf16.mxu1 %v2198_v1 }
  0xd4   : > { %1938 = vmatmul.mubr.msk.bf16.vlgmr.msra.gmra.mrb[28].mxu0 %vm310_vm2, %v1936_v8 }
  0xd5   : > { %1164 = vmatpush1.bf16.msra.mxu0 %v1155_v12  ;;  %1195 = vmatprep.mubr.bf16.mxu0 %v2200_v2 }
  0xd6   : > { %1945 = vmatprep.subr.msk.bf16.mxu0 %vm314_vm1, %v2361_v40  ;;  %2036 = vmatmul.mubr.msk.bf16.vlgmr.msra.gmra.mrb[32].mxu1 %vm310_vm2, %v1940_v13 }
  0xd7   : > { %2040 = vmatpush3.bf16.msra.mxu1 %v2365_v41  ;;  %2041 = vmatprep.mubr.msk.bf16.mxu1 %vm2199_vm0, %v2198_v1 }
  0xdc   : > { %1942 = vmatmul.mubr.msk.bf16.vlgmr.msra.gmra.mrb[32].mxu0 %vm310_vm2, %v1940_v13 }
  0xdd   : > { %1274 = vmatpush1.bf16.msra.mxu0 %v2376_v45  ;;  %1305 = vmatprep.mubr.bf16.mxu0 %v2200_v2 }
  0xde   : > { %2042 = vmatmul.mubr.msk.bf16.vlgmr.msra.gmra.mrb[36].mxu1 %vm310_vm2, %v2115_v14 }
  0xdf   : > { %1726 = vmatprep.mubr.f32.mxu1 %v2198_v1 }
  0xe4   : > { %1946 = vmatmul.mubr.msk.bf16.vlgmr.msra.gmra.mrb[36].mxu0 %vm310_vm2, %v2115_v14  ;;  %vm1360_vm2 = vcmask 1041408  }
 0x168   : > { %v399_v15 = vpop.f32.mrb[0].mxu1 }
 0x169   : > { %v1989_v16 = vpop.f32.mrb[1].mxu1 }
 0x16a   : > { %v402_v17 = vpop.f32.mrb[2].mxu1 }
 0x16b   : > { %v1990_v18 = vpop.f32.mrb[3].mxu1 }
 0x16f   : > { %v358_v19 = vpop.f32.mrb[0].mxu0 }
 0x170   : > { %v360_v20 = vpop.f32.mrb[1].mxu0 }
 0x171   : > { %v362_v21 = vpop.f32.mrb[2].mxu0  ;;  %v492_v22 = vpop.f32.mrb[4].mxu1 }
 0x172   : > { %v363_v23 = vpop.f32.mrb[3].mxu0  ;;  %v493_v24 = vadd.f32 %v492_v22, %v399_v15  ;;  %v1995_v25 = vpop.f32.mrb[5].mxu1 }
 0x173   : > { %v495_v26 = vpop.f32.mrb[6].mxu1 }
 0x174   : > { %v1996_v27 = vpop.f32.mrb[7].mxu1 }
 0x177   : > { %v451_v28 = vpop.f32.mrb[4].mxu0 }
 0x178   : > { %v452_v29 = vadd.f32 %v451_v28, %v358_v19  ;;  %v453_v30 = vpop.f32.mrb[5].mxu0 }
 0x179   : > { %v454_v31 = vadd.f32 %v453_v30, %v360_v20  ;;  %v455_v32 = vpop.f32.mrb[6].mxu0  ;;  %v596_v33 = vpop.f32.mrb[8].mxu1 }
 0x17a   : > { %v456_v34 = vpop.f32.mrb[7].mxu0  ;;  %v604_v35 = vadd.f32 %v596_v33, %v493_v24  ;;  %v2001_v36 = vpop.f32.mrb[9].mxu1  ;;  %v1426_v32 = vlaneseq }
 0x17b   : > { %v599_v37 = vpop.f32.mrb[10].mxu1 }
 0x17c   : > { %v2002_v38 = vpop.f32.mrb[11].mxu1 }
 0x17f   : > { %v555_v39 = vpop.f32.mrb[8].mxu0 }
 0x180   : > { %v602_v40 = vadd.f32 %v555_v39, %v452_v29  ;;  %v557_v41 = vpop.f32.mrb[9].mxu0  ;;  %v280_v39 = vld [vmem:[%s2588_s1] sm:$0x7] }
 0x181   : > { %v603_v42 = vadd.f32 %v557_v41, %v454_v31  ;;  %v559_v43 = vpop.f32.mrb[10].mxu0  ;;  %v703_v44 = vpop.f32.mrb[12].mxu1  ;;  %vm281_vm11 = vcmp.gt.f32.partialorder %v280_v39, 0.5 }
 0x182   : > { %v560_v45 = vpop.f32.mrb[11].mxu0  ;;  %v711_v46 = vadd.f32 %v703_v44, %v604_v35  ;;  %v2007_v47 = vpop.f32.mrb[13].mxu1  ;;  %v1427_v43 = vshrl.u32 %v1426_v32, 7 }
 0x183   : > { %v706_v48 = vpop.f32.mrb[14].mxu1 }
 0x184   : > { %v2008_v49 = vpop.f32.mrb[15].mxu1  ;;  %v1263_v48 = vpop.permute.xlu0 %1262 }
 0x185   : > { %v1425_v49 = vsel %vm281_vm11, 1, %v2200_v2 }
 0x187   : > { %v662_v50 = vpop.f32.mrb[12].mxu0 }
 0x188   : > { %v709_v51 = vadd.f32 %v662_v50, %v602_v40  ;;  %v664_v52 = vpop.f32.mrb[13].mxu0  ;;  %v1428_v50 = vsub.s32 0, %v1427_v43 }
 0x189   : > { %v710_v53 = vadd.f32 %v664_v52, %v603_v42  ;;  %v666_v54 = vpop.f32.mrb[14].mxu0  ;;  %v810_v55 = vpop.f32.mrb[16].mxu1 }
 0x18a   : > { %v667_v56 = vpop.f32.mrb[15].mxu0  ;;  %v818_v57 = vadd.f32 %v810_v55, %v711_v46  ;;  %v2013_v58 = vpop.f32.mrb[17].mxu1  ;;  %v1436_v46 = vsub.s32 2, %v1427_v43  ;;  %v1432_v54 = vsub.s32 1, %v1427_v43 }
 0x18b   : > { %v813_v59 = vpop.f32.mrb[18].mxu1 }
 0x18c   : > { %v2014_v60 = vpop.f32.mrb[19].mxu1  ;;  %v2455_v55 = vrot.slane %v1425_v49, %v1436_v46  ;;  %v2463_v2 = vrot.slane %v1425_v49, %v1432_v54 }
 0x18e   : > { %vm1440_vm12 = vcmp.eq.s32.totalorder %v2455_v55, 1  ;;  %vm1439_vm1 = vcmp.eq.s32.totalorder %v2463_v2, 1  ;;  %v1957_v55 = vld [vmem:[#allocation2] ss:$0 sm:$0xff] }
 0x18f   : > { %v769_v61 = vpop.f32.mrb[16].mxu0 }
 0x190   : > { %v816_v62 = vadd.f32 %v769_v61, %v709_v51  ;;  %v771_v63 = vpop.f32.mrb[17].mxu0 }
 0x191   : > { %v817_v0 = vadd.f32 %v771_v63, %v710_v53  ;;  %v773_v3 = vpop.f32.mrb[18].mxu0  ;;  %v917_v4 = vpop.f32.mrb[20].mxu1  ;;  %v2459_v63 = vrot.slane %v1425_v49, %v1428_v50 }
 0x192   : > { %v774_v5 = vpop.f32.mrb[19].mxu0  ;;  %v925_v6 = vadd.f32 %v917_v4, %v818_v57  ;;  %v2019_v7 = vpop.f32.mrb[21].mxu1 }
 0x193   : > { %v920_v8 = vpop.f32.mrb[22].mxu1  ;;  %v1258_v53 = vpop.permute.xlu1 %1257  ;;  %vm1438_vm14 = vcmp.eq.s32.totalorder %v2459_v63, 1 }
 0x194   : > { %v2020_v9 = vpop.f32.mrb[23].mxu1 }
 0x197   : > { %v876_v10 = vpop.f32.mrb[20].mxu0 }
 0x198   : > { %v923_v11 = vadd.f32 %v876_v10, %v816_v62  ;;  %v878_v12 = vpop.f32.mrb[21].mxu0 }
 0x199   : > { %v924_v13 = vadd.f32 %v878_v12, %v817_v0  ;;  %v880_v14 = vpop.f32.mrb[22].mxu0  ;;  %v1024_v15 = vpop.f32.mrb[24].mxu1 }
 0x19a   : > { %v881_v16 = vpop.f32.mrb[23].mxu0  ;;  %v1032_v17 = vadd.f32 %v1024_v15, %v925_v6  ;;  %v2025_v18 = vpop.f32.mrb[25].mxu1 }
 0x19b   : > { %v1027_v19 = vpop.f32.mrb[26].mxu1 }
 0x19c   : > { %v2026_v20 = vpop.f32.mrb[27].mxu1 }
 0x19f   : > { %v983_v21 = vpop.f32.mrb[24].mxu0 }
 0x1a0   : > { %v1030_v22 = vadd.f32 %v983_v21, %v923_v11  ;;  %v985_v23 = vpop.f32.mrb[25].mxu0 }
 0x1a1   : > { %v1031_v24 = vadd.f32 %v985_v23, %v924_v13  ;;  %v987_v25 = vpop.f32.mrb[26].mxu0  ;;  %v1131_v26 = vpop.f32.mrb[28].mxu1 }
 0x1a2   : > { %v988_v27 = vpop.f32.mrb[27].mxu0  ;;  %v1139_v28 = vadd.f32 %v1131_v26, %v1032_v17  ;;  %v2031_v29 = vpop.f32.mrb[29].mxu1 }
 0x1a3   : > { %v1134_v30 = vpop.f32.mrb[30].mxu1 }
 0x1a4   : > { %v2032_v31 = vpop.f32.mrb[31].mxu1 }
 0x1a7   : > { %v1090_v33 = vpop.f32.mrb[28].mxu0 }
 0x1a8   : > { %v1137_v34 = vadd.f32 %v1090_v33, %v1030_v22  ;;  %v1092_v35 = vpop.f32.mrb[29].mxu0 }
 0x1a9   : > { %v1138_v36 = vadd.f32 %v1092_v35, %v1031_v24  ;;  %v1094_v37 = vpop.f32.mrb[30].mxu0  ;;  %v1238_v38 = vpop.f32.mrb[32].mxu1 }
 0x1aa   : > { %v1095_v40 = vpop.f32.mrb[31].mxu0  ;;  %v2450_v41 = vadd.f32 %v1238_v38, %v1139_v28  ;;  %v2037_v42 = vpop.f32.mrb[33].mxu1 }
 0x1ab   : > { %v1241_v44 = vpop.f32.mrb[34].mxu1 }
 0x1ac   : > { %v2038_v45 = vpop.f32.mrb[35].mxu1 }
 0x1af   : > { %v1197_v47 = vpop.f32.mrb[32].mxu0 }
 0x1b0   : > { %v2453_v51 = vadd.f32 %v1197_v47, %v1137_v34  ;;  %v1199_v52 = vpop.f32.mrb[33].mxu0 }
 0x1b1   : > { %v2457_v56 = vadd.f32 %v1199_v52, %v1138_v36  ;;  %v1201_v57 = vpop.f32.mrb[34].mxu0  ;;  %v1350_v58 = vpop.f32.mrb[36].mxu1 }
 0x1b2   : > { %v1202_v59 = vpop.f32.mrb[35].mxu0  ;;  %v2043_v60 = vpop.f32.mrb[37].mxu1  ;;  %v1351_v62 = vadd.f32 %v1350_v58, %v1258_v53 }
 0x1b3   : > { %v1353_v61 = vpop.f32.mrb[38].mxu1 }
 0x1b4   : > { %v2461_v0 = vadd.f32 %v1353_v61, %v1263_v48  ;;  %v2044_v3 = vpop.f32.mrb[39].mxu1  ;;  %v2471_v6 = vsel %vm1440_vm12, %v1351_v62, 0.0 }
 0x1b5   : > { %v1492_v18 = vsel %vm1491_vm15, %v2471_v6, 0.0 }
 0x1b6   : > { %v1359_v4 = vmul.f32 %v2461_v0, %v2461_v0 }
 0x1b7   : > { %v1307_v5 = vpop.f32.mrb[36].mxu0 }
 0x1b8   : > { %v1376_v7 = vsel %vm1375_vm13, %v1359_v4, 0.0  ;;  %v1394_v8 = vrot.slane %v1359_v4, 2  ;;  %v2474_v9 = vadd.f32 %v1307_v5, %v1258_v53  ;;  %v1309_v10 = vpop.f32.mrb[37].mxu0 }
 0x1b9   : > { %v1377_v11 = vrot.slane %v1376_v7, 4  ;;  %v1310_v12 = vadd.f32 %v1309_v10, %v1258_v53  ;;  %v1311_v13 = vpop.f32.mrb[38].mxu0 }
 0x1ba   : > { %v1412_v14 = vsel %vm1375_vm13, %v1394_v8, 0.0  ;;  %v1444_v15 = vsel %vm1438_vm14, %v2474_v9, 0.0  ;;  %v2481_v16 = vadd.f32 %v1311_v13, %v1263_v48  ;;  %v1313_v17 = vpop.f32.mrb[39].mxu0 }
 0x1bb   : > { %v1378_v19 = vadd.f32 %v1377_v11, %v1376_v7  ;;  %v1413_v20 = vrot.slane %v1412_v14, 4  ;;  %v1445_v21 = vsel %vm1439_vm1, %v1310_v12, 0.0  ;;  %v2487_v22 = vadd.f32 %v1313_v17, %v1263_v48  ;;  %1948 = vmatprep.mubr.msk.f32.mxu0 %vm1439_vm1, %v1310_v12 }
 0x1bc   : > { %v1357_v23 = vmul.f32 %v2481_v16, %v2481_v16  ;;  %v1490_v24 = vadd.f32 %v1445_v21, %v1444_v15 }
 0x1bd   : > { %v1379_v25 = vrot.slane %v1378_v19, 2  ;;  %v1414_v26 = vadd.f32 %v1413_v20, %v1412_v14  ;;  %v1358_v27 = vmul.f32 %v2487_v22, %v2487_v22  ;;  %v286_v14 = vld [vmem:[%s2592_s5] sm:$0xff] }
 0x1be   : > { %v1361_v28 = vsel %vm1360_vm2, %v1357_v23, 0.0  ;;  %v1392_v29 = vrot.slane %v1357_v23, 2  ;;  %v1493_v30 = vadd.f32 %v1492_v18, %v1490_v24 }
 0x1bf   : > { %v1380_v31 = vadd.f32 %v1379_v25, %v1378_v19  ;;  %v1415_v32 = vrot.slane %v1414_v26, 2  ;;  %v1362_v33 = vrot.slane %v1361_v28, 4  ;;  %v1368_v34 = vsel %vm1360_vm2, %v1358_v27, 0.0 }
 0x1c0   : > { %v1398_v35 = vsel %vm1360_vm2, %v1392_v29, 0.0  ;;  %v1369_v36 = vrot.slane %v1368_v34, 4  ;;  %v1393_v37 = vrot.slane %v1358_v27, 2  ;;  %1494 = vadd.xlane.f32.xlu0 %v1493_v30 }
 0x1c1   : > { %v1381_v38 = vrot.slane %v1380_v31, 1  ;;  %v1416_v39 = vadd.f32 %v1415_v32, %v1414_v26  ;;  %v1363_v40 = vadd.f32 %v1362_v33, %v1361_v28  ;;  %v1399_v42 = vrot.slane %v1398_v35, 4 }
 0x1c2   : > { %v1370_v43 = vadd.f32 %v1369_v36, %v1368_v34  ;;  %v1405_v44 = vsel %vm1360_vm2, %v1393_v37, 0.0 }
 0x1c3   : > { %v1382_v45 = vadd.f32 %v1381_v38, %v1380_v31  ;;  %v1417_v46 = vrot.slane %v1416_v39, 1  ;;  %v1364_v47 = vrot.slane %v1363_v40, 2  ;;  %v1400_v48 = vadd.f32 %v1399_v42, %v1398_v35 }
 0x1c4   : > { %v1371_v49 = vrot.slane %v1370_v43, 2  ;;  %v1406_v50 = vrot.slane %v1405_v44, 4 }
 0x1c5   : > { %2116 = vrsqrt.f32 %v1382_v45  ;;  %v1365_v52 = vadd.f32 %v1364_v47, %v1363_v40  ;;  %v1401_v53 = vrot.slane %v1400_v48, 2  ;;  %v1418_v58 = vadd.f32 %v1417_v46, %v1416_v39 }
 0x1c6   : > { %v1372_v54 = vadd.f32 %v1371_v49, %v1370_v43  ;;  %v1407_v57 = vadd.f32 %v1406_v50, %v1405_v44 }
 0x1c7   : > { %v1366_v59 = vrot.slane %v1365_v52, 1  ;;  %v1402_v60 = vadd.f32 %v1401_v53, %v1400_v48  ;;  %2118 = vrsqrt.f32 %v1418_v58 }
 0x1c8   : > { %v1373_v61 = vrot.slane %v1372_v54, 1  ;;  %v1408_v62 = vrot.slane %v1407_v57, 2 }
 0x1c9   : > { %v1367_v3 = vadd.f32 %v1366_v59, %v1365_v52  ;;  %v1403_v4 = vrot.slane %v1402_v60, 1 }
 0x1ca   : > { %v1374_v5 = vadd.f32 %v1373_v61, %v1372_v54  ;;  %v1409_v7 = vadd.f32 %v1408_v62, %v1407_v57 }
 0x1cb   : > { %2120 = vrsqrt.f32 %v1367_v3  ;;  %v1404_v8 = vadd.f32 %v1403_v4, %v1402_v60 }
 0x1cc   : > { %2122 = vrsqrt.f32 %v1374_v5  ;;  %v1410_v10 = vrot.slane %v1409_v7, 1 }
 0x1cd   : > { %2124 = vrsqrt.f32 %v1404_v8 }
 0x1ce   : > { %v1411_v11 = vadd.f32 %v1410_v10, %v1409_v7 }
 0x1cf   : > { %v2117_v12 = vpop.eup %2116 }
 0x1d0   : > { %2126 = vrsqrt.f32 %v1411_v11  ;;  %v1388_v13 = vmul.f32 %v2117_v12, %v2461_v0 }
 0x1d1   : > { %v2119_v15 = vpop.eup %2118 }
 0x1d2   : > { %v1424_v24 = vmul.f32 %v2119_v15, %v2461_v0 }
 0x1d5   : > { %v2121_v17 = vpop.eup %2120 }
 0x1d6   : > { %v2123_v18 = vpop.eup %2122  ;;  %1249 = vperm.xlu0 %2110, %v286_v14   ;;  %v1386_v21 = vmul.f32 %v2121_v17, %v2481_v16 }
 0x1d7   : > { %v2125_v19 = vpop.eup %2124  ;;  %v1387_v20 = vmul.f32 %v2123_v18, %v2487_v22 }
 0x1d8   : > { %v1422_v23 = vmul.f32 %v2125_v19, %v2481_v16  ;;  %v1443_v16 = vsel %vm1440_vm12, %v1424_v24, 0.0 }
 0x1d9   : > { %1952 = vmatprep.subr.msk.mxu1 %vm1360_vm2, %v1387_v20  ;;  %v1452_v33 = vsel %vm1451_vm4, %v1443_v16, 0.0 }
 0x1da   : > { %v2127_v25 = vpop.eup %2126  ;;  %v1441_v26 = vsel %vm1438_vm14, %v1422_v23, 0.0  ;;  %1953 = vmatpush1.msk.msra.mxu1 %vm1360_vm2, %v1386_v21 }
 0x1db   : > { %v1423_v27 = vmul.f32 %v2127_v25, %v2487_v22  ;;  %2050 = vmatprep.subr.mxu1 %v2198_v1  ;;  %v1448_v28 = vsel %vm1447_vm3, %v1441_v26, 0.0  ;;  %v1499_v31 = vrot.slane %v1441_v26, 2  ;;  %v1501_v22 = vrot.slane %v1443_v16, 2 }
 0x1dd   : > { %v1442_v29 = vsel %vm1439_vm1, %v1423_v27, 0.0 }
 0x1de   : > { %v1500_v0 = vrot.slane %v1442_v29, 2  ;;  %v1449_v30 = vsel %vm1447_vm3, %v1442_v29, 0.0 }
 0x1df   : > { %v1450_v32 = vadd.f32 %v1449_v30, %v1448_v28 }
 0x1e0   : > { %1509 = vmatprep.subr.mxu0 %v1500_v0 }
 0x1e1   : > { %1510 = vmatpush1.xpose.msra.mxu0 %v1499_v31  ;;  %v1453_v34 = vadd.f32 %v1452_v33, %v1450_v32 }
 0x1e2   : > { %2045 = vmatprep.subr.mxu0 %v2198_v1 }
 0x1e3   : > { %1454 = vadd.xlane.f32.xlu1 %v1453_v34 }
 0x1e4   : > { %1949 = vmatmul.mubr.msk.f32.vlgmr.msra.gmra.mrb[40].mxu0 %vm1438_vm14, %v2474_v9 }
 0x1e5   : > { %2046 = vmatpush3.xpose.msk.msra.mxu0 %vm1491_vm15, %v1501_v22  ;;  %2047 = vmatprep.mubr.msk.f32.mxu0 %vm2199_vm0, %v2198_v1 }
 0x1ec   : > { %2048 = vmatmul.mubr.msk.f32.vlgmr.msra.gmra.mrb[40].mxu0 %vm1491_vm15, %v2471_v6 }
 0x1f4   : > { %1815 = vperm.xlu1 %2111, %v1957_v55  }
 0x24d   : > { %v1495_v7 = vpop.xlane.xlu0 %1494 }
 0x270   : > { %v1455_v63 = vpop.xlane.xlu1 %1454 }
 0x271   : > { %v1456_v9 = vadd.f32 1e-06, %v1455_v63 }
 0x273   : > { %v1458_v36 = vrot.slane %v1456_v9, 2 }
 0x274   : > { %v1816_v18 = vpop.permute.xlu1 %1815 }
 0x275   : > { %v1460_v37 = vmul.f32 %v1458_v36, %v1386_v21  ;;  %v1461_v38 = vmul.f32 %v1458_v36, %v1387_v20  ;;  %v1462_v39 = vmul.f32 %v1458_v36, %v1388_v13 }
 0x277   : > { %v1463_v6 = vsel %vm1360_vm2, %v1460_v37, 0.0  ;;  %v1470_v40 = vsel %vm1360_vm2, %v1461_v38, 0.0  ;;  %v1477_v44 = vsel %vm1375_vm13, %v1462_v39, 0.0 }
 0x278   : > { %v1464_v42 = vrot.slane %v1463_v6, 4  ;;  %v1471_v43 = vrot.slane %v1470_v40, 4  ;;  %v1478_v46 = vrot.slane %v1477_v44, 4 }
 0x27a   : > { %v1465_v45 = vadd.f32 %v1464_v42, %v1463_v6  ;;  %v1472_v47 = vadd.f32 %v1471_v43, %v1470_v40 }
 0x27c   : > { %v1466_v48 = vrot.slane %v1465_v45, 2  ;;  %v1473_v49 = vrot.slane %v1472_v47, 2 }
 0x27e   : > { %v1467_v50 = vadd.f32 %v1466_v48, %v1465_v45  ;;  %v1474_v53 = vadd.f32 %v1473_v49, %v1472_v47 }
 0x280   : > { %v1468_v54 = vrot.slane %v1467_v50, 1  ;;  %v1475_v58 = vrot.slane %v1474_v53, 1 }
 0x282   : > { %v1469_v59 = vadd.f32 %v1468_v54, %v1467_v50  ;;  %v1476_v61 = vadd.f32 %v1475_v58, %v1474_v53 }
 0x284   : > { %v1484_v3 = vadd.f32 256.0, %v1469_v59  ;;  %v1485_v4 = vadd.f32 256.0, %v1476_v61 }
 0x286   : > { %2128 = vrcp.f32 %v1484_v3 }
 0x287   : > { %2130 = vrcp.f32 %v1485_v4 }
 0x290   : > { %v2129_v12 = vpop.eup %2128 }
 0x291   : > { %v2131_v15 = vpop.eup %2130 }
 0x2bf   : > { %v1645_v2 = vpop.f32.mrb[40].mxu0 }
 0x2c0   : > { %v2049_v35 = vpop.f32.mrb[41].mxu0  ;;  %1954 = vmatmul.mubr.msk.f32.vlgmr.msra.gmra.mrb[40].mxu1 %vm1649_vm5, %v1645_v2 }
 0x2c1   : > { %2051 = vmatpush3.msk.msra.mxu1 %vm1360_vm2, %v1388_v13  ;;  %2052 = vmatprep.mubr.msk.f32.mxu1 %vm2199_vm0, %v2198_v1  ;;  %v1479_v1 = vadd.f32 %v1478_v46, %v1477_v44  ;;  %v1250_v13 = vpop.permute.xlu0 %1249 }
 0x2c2   : > { %v1252_v21 = vadd.f32 %v1250_v13, %v2453_v51  ;;  %v1253_v27 = vadd.f32 %v1250_v13, %v2457_v56  ;;  %v1254_v30 = vadd.f32 %v1250_v13, %v2450_v41 }
 0x2c3   : > { %v1480_v52 = vrot.slane %v1479_v1, 2 }
 0x2c4   : > { %2053 = vmatmul.mubr.msk.f32.vlgmr.msra.gmra.mrb[42].mxu1 %vm1649_vm5, %v1645_v2 }
 0x2c5   : > { %v1481_v57 = vadd.f32 %v1480_v52, %v1479_v1 }
 0x2c7   : > { %v1482_v60 = vrot.slane %v1481_v57, 1 }
 0x2c9   : > { %v1483_v62 = vadd.f32 %v1482_v60, %v1481_v57 }
 0x2cb   : > { %v1486_v5 = vadd.f32 256.0, %v1483_v62 }
 0x2cd   : > { %2132 = vrcp.f32 %v1486_v5 }
 0x2d7   : > { %v2133_v26 = vpop.eup %2132 }
 0x393   : > { %v1728_v8 = vpop.f32.mrb[40].mxu1 }
 0x394   : > { %v1803_v10 = vadd.f32 %v1728_v8, %v1495_v7  ;;  %v1730_v11 = vpop.f32.mrb[41].mxu1 }
 0x395   : > { %v1804_v14 = vadd.f32 %v1730_v11, %v1495_v7 }
 0x396   : > { %v1806_v17 = vmul.f32 %v2129_v12, %v1803_v10 }
 0x397   : > { %v1807_v19 = vmul.f32 %v2131_v15, %v1804_v14  ;;  %v1799_v20 = vpop.f32.mrb[42].mxu1 }
 0x398   : > { %v1818_v23 = vmul.f32 %v1816_v18, %v1806_v17  ;;  %v1805_v24 = vadd.f32 %v1799_v20, %v1495_v7  ;;  %v2054_v25 = vpop.f32.mrb[43].mxu1 }
 0x399   : > { %v1819_v28 = vmul.f32 %v1816_v18, %v1807_v19 }
 0x39a   : > { %v1821_v29 = vadd.f32 %v1818_v23, %v1252_v21  ;;  %v1808_v16 = vmul.f32 %v2133_v26, %v1805_v24 }
 0x39b   : > { %v1822_v0 = vadd.f32 %v1819_v28, %v1253_v27 }
 0x39c   : > { %v1820_v31 = vmul.f32 %v1816_v18, %v1808_v16  ;;  %1824 = vst [vmem:[%s273_s10] sm:$0xff] %v1821_v29 }
 0x39d   : > { %1825 = vst [vmem:[%s273_s10 + $0x8] sm:$0xff] %v1822_v0 }
 0x39e   : > { %v1823_v51 = vadd.f32 %v1820_v31, %v1254_v30 }
 0x3a0   : > { %1826 = vst.msk [vmem:[%s273_s10 + $0x10] sm:$0xff] %vm1491_vm15, %v1823_v51 }
 0x3a1   : > { %2147 = shalt.err (!%p2144_p3)
}
 0x3a2   : > { %s2148_s22 = scalar_lea.hbm %s2542_s17, 384  ;;  %s2152_s25 = scalar_lea.hbm %s2594_s7, 768 }
 0x3a3   : > { %p2149_p4 = scmp.ne.s32.totalorder %s2542_s17, %s2148_s22  ;;  %p2153_p9 = scmp.lt.u32.totalorder %s2542_s17, %s2594_s7 }
 0x3a4   : > { %p2154_p10 = scmp.lt.u32.totalorder %s2152_s25, %s2148_s22  ;;  %p2156_p12 = scmp.lt.u32.totalorder %s2148_s22, %s2542_s17 }
 0x3a5   : > { %p2150_p7 = pnand %p2149_p4, %p2291_p5 }
 0x3a6   : > { %p2155_p11 = por %p2154_p10, %p2153_p9 }
 0x3a7   : > { %p2151_p8 = pneg %p2150_p7 }
 0x3a8   : > { %p2157_p13 = por %p2156_p12, %p2155_p11 }
 0x3aa   : > { %p2158_p0 = pnand %p2157_p13, %p2151_p8 }
 0x3ac   : > { %2161 = shalt.err (!%p2158_p0)
}
 0x3ad   : > { %2060 = dma.vmem_to_hbm [thread:$0]  (%p2291_p5), %s2544_s14, 384, %s2542_s17, %s1828_s6  }
 0x3ae PF: > { %p2066_p1 = scmp.ge.s32.totalorder %s2196_s29, 2  ;;  %s1854_s10 = sand.u32 1, %s2184_s26  }
 0x3af   : > { %s1855_s15 = scalar_lea.sflag [#allocation4], %s1854_s10 }
 0x3b0   : > { %p2063_p2 = pnand %p2066_p1, %p2295_p6 }
 0x3b2   : > { %2179 = dma.done.wait (!%p2063_p2), %s1855_s15, 384  }
 0x3b3   : > { %2181 = vsyncadd (!%p2063_p2), %s1855_s15, 4294966912  ;;  %p19_p3 = scmp.ge.s32.totalorder %s2278_s8, 4   ;;  %s2597_s26 = smov %s2188_s27 }
 0x3b4   : > { %s2598_s27 = smov %s2192_s28  ;;  %s2599_s28 = smov %s2289_s11 }
 0x3b5   : > { %s2600_s29 = smov %s2278_s8  ;;  %21 = sbr.rel (!%p19_p3) target bundleno = 6 (0x6), region = 91 }
 0x3bc   :  { %1860 = vsyncpa [#allocation4], 1 }
 0x3bd   :  { %1862 = vsyncpa [#allocation4 + $0x1], 1 }

</bundles_post_ra>
